<compile_context>
chip_gen: v5e
topology: v5e:2x2
jax: 0.10.0
libtpu: 0.0.40
codegen_flags: <defaults>
</compile_context>

<pallas_src>
import functools
import math

import jax
import jax.numpy as jnp
from jax import lax
from jax.experimental import pallas as pl
from jax.experimental.pallas import tpu as pltpu

EPS = 1e-6          # layernormalization eps = 10**-6
_ROW_CAP = 2048     # rows beyond this show no roofline benefit


# ----------------------------------------------------------------------------
# Generation-aware VMEM budgeting
# ----------------------------------------------------------------------------
def _vmem_budget():
    """Return (block_budget_bytes, vmem_limit_bytes) for this TPU generation.

    128 MiB-VMEM parts (v5e/v6e) run mem-bound streaming kernels at 85%+ of
    the HBM roofline with 512-1024 row tiles, so give them a big budget.
    v7x has only 64 MiB VMEM per TensorCore -> keep the conservative budget.
    Unknown hardware falls back to the conservative (always-safe) budget.
    """
    cap = 0
    try:
        cap = int(getattr(pltpu.get_tpu_info(), "vmem_capacity_bytes", 0))
    except Exception:
        cap = 0
    if cap >= 96 * 1024 * 1024:                     # v5e / v6e (128 MiB VMEM)
        return 64 * 1024 * 1024, 100 * 1024 * 1024
    return 24 * 1024 * 1024, 32 * 1024 * 1024       # v7x (64 MiB) / unknown


def _pick_rows(n_rows, bytes_per_row):
    """Pick a row-tile size so the full per-row working set fits the budget."""
    budget, limit = _vmem_budget()
    tm = budget // max(int(bytes_per_row), 1)
    tm = min(int(tm), n_rows, _ROW_CAP)
    if tm >= n_rows:
        return n_rows, limit          # full axis satisfies the (8,128) rule
    tm = max(8, (tm // 8) * 8)        # sublane-aligned tile
    return tm, limit


# ----------------------------------------------------------------------------
# Shared dropout hash: deterministic per (seed, global flat element index),
# pure uint32 VPU ops, independent of tiling / grid order.
# NOTE: the index space wraps past 2^32 elements (masks would repeat); benign
# at realistic activation sizes.
# ----------------------------------------------------------------------------
def _hash_keep(idx_u32, seed_u32, p):
    h = idx_u32 + seed_u32 * jnp.uint32(0x9E3779B9)
    h = h ^ (h >> 16)
    h = h * jnp.uint32(0x7FEB352D)
    h = h ^ (h >> 15)
    h = h * jnp.uint32(0x846CA68B)
    # splitmix32's final xor-shift omitted: the threshold test below depends
    # on the high bits, already fully mixed by the last multiply.
    threshold = jnp.uint32(min(int(round(p * 4294967296.0)), 0xFFFFFFFF))
    return h >= threshold                            # keep with prob ~(1-p)


def _flat_index_u32(shape, row0, col0, n_cols):
    row = lax.broadcasted_iota(jnp.int32, shape, 0)
    col = lax.broadcasted_iota(jnp.int32, shape, 1)
    return ((row0 + row).astype(jnp.uint32) * jnp.uint32(n_cols)
            + (col0 + col).astype(jnp.uint32))


# ----------------------------------------------------------------------------
# Kernel 1: layernormalization  (alpha * (x - mean) / (std + eps) + bias)
# ----------------------------------------------------------------------------
def _layernorm_kernel(x_ref, alpha_ref, bias_ref, o_ref):
    x = x_ref[...].astype(jnp.float32)                     # (TM, F)
    f = x.shape[-1]
    mean = jnp.mean(x, axis=-1, keepdims=True)
    diff = x - mean
    # torch.std default: unbiased estimator (divide by N-1).
    var = jnp.sum(diff * diff, axis=-1, keepdims=True) * jnp.float32(1.0 / (f - 1))
    # per-row reciprocal instead of a (TM, F) element-wise divide
    inv = 1.0 / (jnp.sqrt(var) + jnp.float32(EPS))         # (TM, 1)
    y = (diff * inv) * alpha_ref[...].astype(jnp.float32) \
        + bias_ref[...].astype(jnp.float32)
    o_ref[...] = y.astype(o_ref.dtype)


def layernorm(x, alpha, bias, out_dtype=None):
    *lead, F = x.shape
    out_dtype = x.dtype if out_dtype is None else jnp.dtype(out_dtype)
    M = math.prod(lead) if lead else 1
    x2 = x.reshape(M, F)
    in_item = jnp.dtype(x.dtype).itemsize
    out_item = jnp.dtype(out_dtype).itemsize
    # 2 double-buffered x tiles + 2 out tiles + ~3 tile-sized f32 temporaries.
    bytes_per_row = F * (2 * in_item + 2 * out_item + 3 * 4)
    tm, vmem_limit = _pick_rows(M, bytes_per_row)
    grid = (pl.cdiv(M, tm),)
    out = pl.pallas_call(
        _layernorm_kernel,
        out_shape=jax.ShapeDtypeStruct((M, F), out_dtype),
        grid_spec=pltpu.PrefetchScalarGridSpec(
            num_scalar_prefetch=0,
            grid=grid,
            in_specs=[
                pl.BlockSpec((tm, F), lambda i: (i, 0)),
                pl.BlockSpec((1, F), lambda i: (0, 0)),
                pl.BlockSpec((1, F), lambda i: (0, 0)),
            ],
            out_specs=pl.BlockSpec((tm, F), lambda i: (i, 0)),
        ),
        compiler_params=pltpu.CompilerParams(
            dimension_semantics=("parallel",),
            vmem_limit_bytes=vmem_limit),
    )(x2, alpha.reshape(1, F), bias.reshape(1, F))
    return out.reshape(*lead, F) if lead else out.reshape(F)


# ----------------------------------------------------------------------------
# Kernel 2: residual add + inverted dropout (nn.Dropout training semantics).
# ----------------------------------------------------------------------------
def _residual_dropout_kernel(seed_ref, x_ref, y_ref, o_ref, *, p):
    x = x_ref[...]                                         # (TM, F), native dtype
    if p >= 1.0:                                           # everything dropped
        o_ref[...] = x.astype(o_ref.dtype)
        return
    y = y_ref[...]
    if p > 0.0:
        tm, f = y.shape
        idx = _flat_index_u32(y.shape, pl.program_id(0) * tm, 0, f)
        keep = _hash_keep(idx, seed_ref[0].astype(jnp.uint32), p)
        scale = jnp.asarray(1.0 / (1.0 - p), dtype=y.dtype)
        y = jnp.where(keep, y * scale, jnp.zeros_like(y))
    o_ref[...] = (x + y).astype(o_ref.dtype)


def residual_dropout_add(x, sub_out, *, dropout_p, seed, training=True):
    *lead, F = x.shape
    assert sub_out.shape == x.shape
    M = math.prod(lead) if lead else 1
    p = float(dropout_p) if training else 0.0
    x2 = x.reshape(M, F)
    y2 = sub_out.reshape(M, F)
    x_item = jnp.dtype(x.dtype).itemsize
    y_item = jnp.dtype(sub_out.dtype).itemsize
    # x, sub_out, out double-buffered + ~2 tile-sized u32 temporaries (idx/h).
    bytes_per_row = F * (2 * (2 * x_item + y_item) + 2 * 4)
    tm, vmem_limit = _pick_rows(M, bytes_per_row)
    grid = (pl.cdiv(M, tm),)
    kernel = functools.partial(_residual_dropout_kernel, p=p)
    out = pl.pallas_call(
        kernel,
        out_shape=jax.ShapeDtypeStruct((M, F), x.dtype),
        grid_spec=pltpu.PrefetchScalarGridSpec(
            num_scalar_prefetch=1,
            grid=grid,
            in_specs=[
                pl.BlockSpec((tm, F), lambda i, s: (i, 0)),
                pl.BlockSpec((tm, F), lambda i, s: (i, 0)),
            ],
            out_specs=pl.BlockSpec((tm, F), lambda i, s: (i, 0)),
        ),
        # Alias x (operand 1; operand 0 is the scalar-prefetch seed) to the
        # output: same shape/dtype, removes one B*S*F output allocation when
        # the caller donates x.
        input_output_aliases={1: 0},
        compiler_params=pltpu.CompilerParams(
            dimension_semantics=("parallel",),
            vmem_limit_bytes=vmem_limit),
    )(jnp.asarray([seed], dtype=jnp.int32), x2, y2)
    return out.reshape(*lead, F) if lead else out.reshape(F)


# ----------------------------------------------------------------------------
# Fused kernel for the common Linear sublayer:
#   out = x + dropout(layernorm(x) @ W + b)
# Single pallas_call: LN prologue -> MXU matmul -> dropout/residual epilogue.
# Removes the `normed` and `sub_out` HBM round trips of the generic path.
# ----------------------------------------------------------------------------
def _fused_kernel(seed_ref, xk_ref, w_ref, bsub_ref, alpha_ref, bias_ref,
                  xres_ref, o_ref, *, p, n_out):
    # --- layernorm prologue (full feature row resident) ---
    x = xk_ref[...].astype(jnp.float32)                     # (TM, F)
    f = x.shape[-1]
    mean = jnp.mean(x, axis=-1, keepdims=True)
    diff = x - mean
    var = jnp.sum(diff * diff, axis=-1, keepdims=True) * jnp.float32(1.0 / (f - 1))
    inv = 1.0 / (jnp.sqrt(var) + jnp.float32(EPS))
    ln = (diff * inv) * alpha_ref[...].astype(jnp.float32) \
         + bias_ref[...].astype(jnp.float32)
    # --- Linear sublayer on the MXU ---
    acc = jnp.dot(ln.astype(w_ref.dtype), w_ref[...],
                  preferred_element_type=jnp.float32)       # (TM, TN)
    acc = acc + bsub_ref[...].astype(jnp.float32)
    # --- dropout + residual epilogue ---
    if p >= 1.0:
        o_ref[...] = xres_ref[...].astype(o_ref.dtype)
        return
    if p > 0.0:
        tm, tn = acc.shape
        idx = _flat_index_u32(acc.shape, pl.program_id(0) * tm,
                              pl.program_id(1) * tn, n_out)
        keep = _hash_keep(idx, seed_ref[0].astype(jnp.uint32), p)
        acc = jnp.where(keep, acc * jnp.float32(1.0 / (1.0 - p)),
                        jnp.zeros_like(acc))
    o_ref[...] = (xres_ref[...].astype(jnp.float32) + acc).astype(o_ref.dtype)


def residual_connection_linear(x, w, b_sub, alpha, bias, *, dropout_p, seed,
                               training=True):
    *lead, F = x.shape
    K, N = w.shape
    assert K == F and N == F, "residual requires sublayer out dim == in dim"
    M = math.prod(lead) if lead else 1
    x2 = x.reshape(M, F)
    p = float(dropout_p) if training else 0.0

    # Column tile (lane dim): full if small, else 512 (multiple of 128).
    tn = N if N <= 512 else 512
    item = jnp.dtype(x.dtype).itemsize
    w_item = jnp.dtype(w.dtype).itemsize
    budget, vmem_limit = _vmem_budget()
    # Non-per-row VMEM: double-buffered (F, tn) weight + (1, tn) bias tiles.
    fixed = 2 * (F * tn + tn) * w_item
    avail = max(budget - fixed, 2 * 1024 * 1024)
    # Per-row: 2x (TM,F) lhs + ~3 f32 (TM,F) temps; 2x (TM,tn) x_res,
    # 2x (TM,tn) out, ~3 (TM,tn) f32/u32 temps (acc, mask, idx).
    bytes_per_row = F * (2 * item + 3 * 4) + tn * (2 * item + 2 * item + 3 * 4)
    tm = min(avail // max(bytes_per_row, 1), M, _ROW_CAP)
    tm = M if tm >= M else max(8, (int(tm) // 8) * 8)

    grid = (pl.cdiv(M, tm), pl.cdiv(N, tn))
    kernel = functools.partial(_fused_kernel, p=p, n_out=N)
    out = pl.pallas_call(
        kernel,
        out_shape=jax.ShapeDtypeStruct((M, N), x.dtype),
        grid_spec=pltpu.PrefetchScalarGridSpec(
            num_scalar_prefetch=1,
            grid=grid,
            in_specs=[
                pl.BlockSpec((tm, F), lambda i, j, s: (i, 0)),   # x row tile (LN+LHS)
                pl.BlockSpec((F, tn), lambda i, j, s: (0, j)),   # W
                pl.BlockSpec((1, tn), lambda i, j, s: (0, j)),   # linear bias
                pl.BlockSpec((1, F), lambda i, j, s: (0, 0)),    # LN alpha
                pl.BlockSpec((1, F), lambda i, j, s: (0, 0)),    # LN bias
                pl.BlockSpec((tm, tn), lambda i, j, s: (i, j)),  # x residual slice
            ],
            out_specs=pl.BlockSpec((tm, tn), lambda i, j, s: (i, j)),
        ),
        compiler_params=pltpu.CompilerParams(
            dimension_semantics=("parallel", "parallel"),
            vmem_limit_bytes=vmem_limit),
    )(jnp.asarray([seed], dtype=jnp.int32), x2, w, b_sub.reshape(1, N),
      alpha.reshape(1, F), bias.reshape(1, F), x2)
    return out.reshape(*lead, N) if lead else out.reshape(N)


# ----------------------------------------------------------------------------
# ResidualConnection.forward(x, sublayer) — generic (unfused) path.
# ----------------------------------------------------------------------------
def residual_connection(x, sublayer, alpha, bias, *, dropout_p, seed,
                        training=True, norm_dtype=None):
    # TODO(synk): `sublayer` is an arbitrary callable, so it cannot be fused
    # generically; use residual_connection_linear() for the Linear case.
    normed = layernorm(x, alpha, bias, out_dtype=norm_dtype)
    sub_out = sublayer(normed)                 # plain-JAX glue
    return residual_dropout_add(x, sub_out, dropout_p=dropout_p, seed=seed,
                                training=training)


# ----------------------------------------------------------------------------
# Demo / sanity check
# ----------------------------------------------------------------------------
if __name__ == "__main__":
    batch, seq, features = 2, 16, 128    # lane-dense feature dim
    dropout_p = 0.1

    key = jax.random.PRNGKey(0)
    kx, kw, kb = jax.random.split(key, 3)
    x = jax.random.normal(kx, (batch, seq, features), dtype=jnp.float32)

    # Module parameters (matching nn.Parameter shapes / init).
    alpha = jnp.ones((features,), dtype=jnp.float32)
    bias = jnp.zeros((features,), dtype=jnp.float32)

    # A simple deterministic Linear sublayer.
    W = jax.random.normal(kw, (features, features), dtype=jnp.float32) * 0.02
    b_lin = jax.random.normal(kb, (features,), dtype=jnp.float32) * 0.02

    def sublayer(h):
        return jnp.dot(h, W, precision=jax.lax.Precision.HIGHEST) + b_lin

    # Pure-JAX reference (eval mode / dropout identity).
    mean = jnp.mean(x, axis=-1, keepdims=True)
    std = jnp.std(x, axis=-1, keepdims=True, ddof=1)       # unbiased, like torch.std
    normed_ref = alpha * (x - mean) / (std + EPS) + bias
    sub_ref = sublayer(normed_ref)
    ref_eval = x + sub_ref

    # --- generic (unfused) path, eval mode ---
    out_eval = residual_connection(x, sublayer, alpha, bias,
                                   dropout_p=dropout_p, seed=0, training=False)
    out_eval = jax.block_until_ready(out_eval)
    assert jnp.allclose(out_eval, ref_eval, atol=1e-5, rtol=1e-5), (
        float(jnp.max(jnp.abs(out_eval - ref_eval))))

    # --- fused LN + Linear + dropout + residual path, eval mode ---
    out_eval_f = residual_connection_linear(x, W, b_lin, alpha, bias,
                                            dropout_p=dropout_p, seed=0,
                                            training=False)
    out_eval_f = jax.block_until_ready(out_eval_f)
    assert jnp.allclose(out_eval_f, ref_eval, atol=2e-2, rtol=2e-2), (
        float(jnp.max(jnp.abs(out_eval_f - ref_eval))))

    # --- generic path, training mode ---
    out_train = residual_connection(x, sublayer, alpha, bias,
                                    dropout_p=dropout_p, seed=1234,
                                    training=True)
    out_train = jax.block_until_ready(out_train)
    assert bool(jnp.all(jnp.isfinite(out_train)))
    kept_val = x + sub_ref * (1.0 / (1.0 - dropout_p))
    ok = (jnp.isclose(out_train, kept_val, atol=1e-4, rtol=1e-4) |
          jnp.isclose(out_train, x, atol=1e-6, rtol=0.0))
    assert bool(jnp.all(ok))
    n_drop = int(jnp.sum(out_train == x))
    frac = n_drop / out_train.size
    assert 0.03 < frac < 0.25, frac          # dropout active, roughly ~p

    # --- fused path, training mode ---
    out_train_f = residual_connection_linear(x, W, b_lin, alpha, bias,
                                             dropout_p=dropout_p, seed=1234,
                                             training=True)
    out_train_f = jax.block_until_ready(out_train_f)
    assert bool(jnp.all(jnp.isfinite(out_train_f)))
    sub_f = out_eval_f - x                   # fused kernel's own sublayer output
    kept_f = x + sub_f * (1.0 / (1.0 - dropout_p))
    ok_f = (jnp.isclose(out_train_f, kept_f, atol=1e-4, rtol=1e-4) |
            jnp.isclose(out_train_f, x, atol=1e-6, rtol=0.0))
    assert bool(jnp.all(ok_f))
    n_drop_f = int(jnp.sum(out_train_f == x))
    frac_f = n_drop_f / out_train_f.size
    assert 0.03 < frac_f < 0.25, frac_f

    print("KERNEL_OK")
</pallas_src>

<mosaic_0001>
module attributes {stable_mosaic.version = 11 : i64} {
  func.func @_layernorm_kernel(%arg0: i32, %arg1: memref<32x128xf32, #tpu.memory_space<vmem>>, %arg2: memref<1x128xf32, #tpu.memory_space<vmem>>, %arg3: memref<1x128xf32, #tpu.memory_space<vmem>>, %arg4: memref<32x128xf32, #tpu.memory_space<vmem>>) attributes {dimension_semantics = [#tpu.dimension_semantics<parallel>], iteration_bounds = array<i64: 1>, scalar_prefetch = 0 : i64, scratch_operands = 0 : i64, tpu.core_type = #tpu.core_type<tc>, window_params = [{transform_indices = @transform_0, window_bounds = array<i64: 32, 128>}, {pipeline_mode = #tpu.pipeline_mode<synchronous>, transform_indices = @transform_1, window_bounds = array<i64: 1, 128>}, {pipeline_mode = #tpu.pipeline_mode<synchronous>, transform_indices = @transform_2, window_bounds = array<i64: 1, 128>}, {transform_indices = @transform_3, window_bounds = array<i64: 32, 128>}]} {
    %c0 = arith.constant 0 : index
    %c0_0 = arith.constant 0 : index
    %0 = vector.load %arg1[%c0, %c0_0] : memref<32x128xf32, #tpu.memory_space<vmem>>, vector<32x128xf32>
    %cst = arith.constant dense<0.000000e+00> : vector<32xf32>
    %1 = vector.multi_reduction <add>, %0, %cst [1] : vector<32x128xf32> to vector<32xf32>
    %2 = vector.shape_cast %1 : vector<32xf32> to vector<32x1xf32>
    %cst_1 = arith.constant 1.280000e+02 : f32
    %3 = vector.broadcast %cst_1 : f32 to vector<32x1xf32>
    %4 = arith.divf %2, %3 : vector<32x1xf32>
    %5 = vector.broadcast %4 : vector<32x1xf32> to vector<32x128xf32>
    %6 = arith.subf %0, %5 : vector<32x128xf32>
    %7 = arith.mulf %6, %6 : vector<32x128xf32>
    %cst_2 = arith.constant dense<0.000000e+00> : vector<32xf32>
    %8 = vector.multi_reduction <add>, %7, %cst_2 [1] : vector<32x128xf32> to vector<32xf32>
    %9 = vector.shape_cast %8 : vector<32xf32> to vector<32x1xf32>
    %cst_3 = arith.constant 0.00787401571 : f32
    %10 = vector.broadcast %cst_3 : f32 to vector<32x1xf32>
    %11 = arith.mulf %9, %10 : vector<32x1xf32>
    %12 = math.sqrt %11 : vector<32x1xf32>
    %cst_4 = arith.constant 9.99999997E-7 : f32
    %13 = vector.broadcast %cst_4 : f32 to vector<32x1xf32>
    %14 = arith.addf %12, %13 : vector<32x1xf32>
    %cst_5 = arith.constant 1.000000e+00 : f32
    %15 = vector.broadcast %cst_5 : f32 to vector<32x1xf32>
    %16 = arith.divf %15, %14 : vector<32x1xf32>
    %17 = vector.broadcast %16 : vector<32x1xf32> to vector<32x128xf32>
    %18 = arith.mulf %6, %17 : vector<32x128xf32>
    %c0_6 = arith.constant 0 : index
    %c0_7 = arith.constant 0 : index
    %19 = vector.load %arg2[%c0_6, %c0_7] : memref<1x128xf32, #tpu.memory_space<vmem>>, vector<1x128xf32>
    %20 = vector.broadcast %19 : vector<1x128xf32> to vector<32x128xf32>
    %21 = arith.mulf %18, %20 : vector<32x128xf32>
    %c0_8 = arith.constant 0 : index
    %c0_9 = arith.constant 0 : index
    %22 = vector.load %arg3[%c0_8, %c0_9] : memref<1x128xf32, #tpu.memory_space<vmem>>, vector<1x128xf32>
    %23 = vector.broadcast %22 : vector<1x128xf32> to vector<32x128xf32>
    %24 = arith.addf %21, %23 : vector<32x128xf32>
    %c0_10 = arith.constant 0 : index
    %c0_11 = arith.constant 0 : index
    %25 = vector.load %arg4[%c0_10, %c0_11] : memref<32x128xf32, #tpu.memory_space<vmem>>, vector<32x128xf32>
    tpu.vector_store %arg4[%c0_10, %c0_11], %24 {strides = array<i32>} : memref<32x128xf32, #tpu.memory_space<vmem>>, vector<32x128xf32>,
    return
  }
  func.func @transform_0(%arg0: i32) -> (i32, i32) {
    %c0_i32 = arith.constant 0 : i32
    %c0_i32_0 = arith.constant 0 : i32
    return %arg0, %c0_i32 : i32, i32
  }
  func.func @transform_1(%arg0: i32) -> (i32, i32) {
    %c0_i32 = arith.constant 0 : i32
    %c0_i32_0 = arith.constant 0 : i32
    %c0_i32_1 = arith.constant 0 : i32
    return %c0_i32, %c0_i32_0 : i32, i32
  }
  func.func @transform_2(%arg0: i32) -> (i32, i32) {
    %c0_i32 = arith.constant 0 : i32
    %c0_i32_0 = arith.constant 0 : i32
    %c0_i32_1 = arith.constant 0 : i32
    return %c0_i32, %c0_i32_0 : i32, i32
  }
  func.func @transform_3(%arg0: i32) -> (i32, i32) {
    %c0_i32 = arith.constant 0 : i32
    %c0_i32_0 = arith.constant 0 : i32
    return %arg0, %c0_i32 : i32, i32
  }
}

</mosaic_0001>

<bundles_post_ra>
// kernel: tpu_custom_call.1
= control target key start
LH: loop header
LB: loop body
LE: loop exit
PB: predicated region body
PF: predicated region fallthrough
CT: control target
= control target key end

     0   :  { %8 = vsyncpa [#allocation3], 0  ;;  %s426_s0 = inlined_call_operand.hbm [shape: f32[32,128], index: 0, kind: input, shape index: {}]   ;;  %s427_s1 = inlined_call_operand.hbm [shape: f32[1,128], index: 1, kind: input, shape index: {}]   ;;  %s428_s2 = inlined_call_operand.vmem [shape: f32[1,128], index: 2, kind: input, shape index: {}]   ;;  %s429_s3 = inlined_call_operand.hbm [shape: f32[32,128], index: 3, kind: output, shape index: {}]  }
   0x1   :  { %9 = vsyncpa [#allocation6], 0 }
   0x2   :  { %10 = vsyncpa [#allocation4], 0  ;;  %s15_s14 = sshll.u32 %s426_s0, 4  ;;  %s348_s15 = smov [#allocation2]   ;;  %s16_s14 = int_to_ptr.hbm [resolvable:$true] %s15_s14 }
   0x3   :  { %s17_s16 = sshll.u32 %s348_s15, 4  ;;  %s29_s19 = sshll.u32 %s427_s1, 4  ;;  %s18_s16 = int_to_ptr.vmem [resolvable:$true] %s17_s16  ;;  %s30_s19 = int_to_ptr.hbm [resolvable:$true] %s29_s19 }
   0x4   :  { %s349_s20 = smov 128   ;;  %s350_s21 = smov 8  }
   0x5   :  { %23 = dma.hbm_to_vmem [thread:$0]  %s16_s14, 512, %s18_s16, [#allocation3], %s349_s20, %s349_s20, %s350_s21  }
   0x6   :  { %s351_s22 = smov [#allocation5]  }
   0x7   :  { %s31_s23 = sshll.u32 %s351_s22, 4  ;;  %s32_s23 = int_to_ptr.vmem [resolvable:$true] %s31_s23 }
   0x8   :  { %34 = dma.hbm_to_vmem [thread:$0]  %s30_s19, 16, %s32_s23, [#allocation6]  }
   0x9   :  { %342 = dma.done.wait [#allocation3], 512  }
   0xa   :  { %343 = vsyncadd [#allocation3], 4294966784 }
   0xb   :  { %344 = dma.done.wait [#allocation6], 16  }
   0xc   :  { %345 = vsyncadd [#allocation6], 4294967280  ;;  %v47_v0 = vld [vmem:[#allocation2 + $0x10] sm:$0xff]  ;;  %v45_v1 = vld [vmem:[#allocation2] sm:$0xff]  ;;  %v352_v4 = vmov 128.0   ;;  %s230_s27 = sshll.u32 %s429_s3, 4  ;;  %s231_s27 = int_to_ptr.hbm [resolvable:$true] %s230_s27 }
   0xd   :  { %53 = vadd.xlane.f32.xlu1 %v47_v0  ;;  %49 = vadd.xlane.f32.xlu0 %v45_v1  ;;  %v48_v2 = vld [vmem:[#allocation2 + $0x18] sm:$0xff]  ;;  %v46_v3 = vld [vmem:[#allocation2 + $0x8] sm:$0xff]  ;;  %252 = vrcp.f32 %v352_v4 }
  0x13   :  { %v253_v5 = vpop.eup %252 }
  0x14   :  { %v58_v6 = vmul.f32 128.0, %v253_v5  ;;  %vm62_vm0 = vweird.f32 %v253_v5 }
  0x15   :  { %55 = vadd.xlane.f32.xlu1 %v48_v2  ;;  %51 = vadd.xlane.f32.xlu0 %v46_v3 }
  0x16   :  { %v59_v7 = vsub.f32 1.0, %v58_v6 }
  0x18   :  { %v60_v8 = vmul.f32 %v253_v5, %v59_v7 }
  0x1a   :  { %v61_v9 = vadd.f32 %v253_v5, %v60_v8 }
  0x1c   :  { %v63_v10 = vsel %vm62_vm0, %v253_v5, %v61_v9 }
  0x80   :  { %v54_v11 = vpop.xlane.xlu1 %53  ;;  %v50_v12 = vpop.xlane.xlu0 %49 }
  0x81   :  { %v66_v13 = vmul.f32 %v63_v10, %v54_v11  ;;  %v64_v14 = vmul.f32 %v63_v10, %v50_v12 }
  0x83   :  { %v383_v15 = vsub.f32 %v47_v0, %v66_v13  ;;  %v385_v16 = vsub.f32 %v45_v1, %v64_v14 }
  0x85   :  { %v74_v17 = vmul.f32 %v383_v15, %v383_v15  ;;  %v72_v18 = vmul.f32 %v385_v16, %v385_v16 }
  0x87   :  { %80 = vadd.xlane.f32.xlu0 %v74_v17  ;;  %76 = vadd.xlane.f32.xlu2 %v72_v18 }
  0x88   :  { %v56_v19 = vpop.xlane.xlu1 %55  ;;  %v52_v20 = vpop.xlane.xlu0 %51 }
  0x89   :  { %v67_v21 = vmul.f32 %v63_v10, %v56_v19  ;;  %v65_v22 = vmul.f32 %v63_v10, %v52_v20 }
  0x8b   :  { %v391_v23 = vsub.f32 %v48_v2, %v67_v21  ;;  %v393_v24 = vsub.f32 %v46_v3, %v65_v22 }
  0x8d   :  { %v75_v25 = vmul.f32 %v391_v23, %v391_v23  ;;  %v73_v26 = vmul.f32 %v393_v24, %v393_v24 }
  0x8f   :  { %82 = vadd.xlane.f32.xlu1 %v75_v25  ;;  %78 = vadd.xlane.f32.xlu2 %v73_v26 }
  0xfa   :  { %v77_v27 = vpop.xlane.xlu2 %76  ;;  %v81_v28 = vpop.xlane.xlu0 %80 }
  0xfb   :  { %v84_v29 = vmul.f32 0.007874016, %v77_v27  ;;  %v86_v30 = vmul.f32 0.007874016, %v81_v28 }
  0xfd   :  { %254 = vrsqrt.f32 %v84_v29  ;;  %vm95_vm1 = vcmp.eq.f32.partialorder %v84_v29, inf  ;;  %vm97_vm2 = vcmp.eq.f32.partialorder %v84_v29, 0.0  ;;  %v98_v53 = vand.u32 2147483648, %v84_v29 }
  0xfe   :  { %256 = vrsqrt.f32 %v86_v30  ;;  %vm119_vm3 = vcmp.eq.f32.partialorder %v86_v30, inf  ;;  %v122_v57 = vand.u32 2147483648, %v86_v30  ;;  %vm121_vm4 = vcmp.eq.f32.partialorder %v86_v30, 0.0 }
 0x102   :  { %v83_v31 = vpop.xlane.xlu1 %82  ;;  %v79_v32 = vpop.xlane.xlu2 %78 }
 0x103   :  { %v255_v33 = vpop.eup %254  ;;  %v87_v34 = vmul.f32 0.007874016, %v83_v31  ;;  %v85_v35 = vmul.f32 0.007874016, %v79_v32 }
 0x104   :  { %v257_v36 = vpop.eup %256  ;;  %v89_v37 = vmul.f32 %v255_v33, %v84_v29 }
 0x105   :  { %v113_v38 = vmul.f32 %v257_v36, %v86_v30  ;;  %258 = vrsqrt.f32 %v87_v34  ;;  %vm131_vm5 = vcmp.eq.f32.partialorder %v87_v34, inf  ;;  %v134_v6 = vand.u32 2147483648, %v87_v34 }
 0x106   :  { %v90_v39 = vmul.f32 %v255_v33, %v89_v37  ;;  %260 = vrsqrt.f32 %v85_v35  ;;  %vm133_vm6 = vcmp.eq.f32.partialorder %v87_v34, 0.0  ;;  %vm107_vm7 = vcmp.eq.f32.partialorder %v85_v35, inf }
 0x107   :  { %v114_v40 = vmul.f32 %v257_v36, %v113_v38  ;;  %v110_v9 = vand.u32 2147483648, %v85_v35  ;;  %vm109_vm8 = vcmp.eq.f32.partialorder %v85_v35, 0.0 }
 0x108   :  { %v91_v41 = vmul.f32 0.5, %v90_v39  ;;  %v250_v39 = vld [vmem:[#allocation5] ss:$0 sm:$0xff] }
 0x109   :  { %v115_v42 = vmul.f32 0.5, %v114_v40 }
 0x10a   :  { %v92_v43 = vsub.f32 1.5, %v91_v41 }
 0x10b   :  { %v259_v44 = vpop.eup %258  ;;  %v116_v45 = vsub.f32 1.5, %v115_v42 }
 0x10c   :  { %v261_v46 = vpop.eup %260  ;;  %v93_v47 = vmul.f32 %v255_v33, %v92_v43  ;;  %v125_v48 = vmul.f32 %v259_v44, %v87_v34 }
 0x10d   :  { %v117_v49 = vmul.f32 %v257_v36, %v116_v45  ;;  %v101_v50 = vmul.f32 %v261_v46, %v85_v35 }
 0x10e   :  { %v94_v51 = vmul.f32 %v93_v47, %v84_v29  ;;  %v126_v52 = vmul.f32 %v259_v44, %v125_v48 }
 0x10f   :  { %v118_v54 = vmul.f32 %v117_v49, %v86_v30  ;;  %v102_v55 = vmul.f32 %v261_v46, %v101_v50 }
 0x110   :  { %v96_v56 = vsel %vm95_vm1, %v84_v29, %v94_v51  ;;  %v127_v58 = vmul.f32 0.5, %v126_v52 }
 0x111   :  { %v99_v59 = vsel %vm97_vm2, %v98_v53, %v96_v56  ;;  %v120_v60 = vsel %vm119_vm3, %v86_v30, %v118_v54  ;;  %v103_v61 = vmul.f32 0.5, %v102_v55 }
 0x112   :  { %v136_v62 = vadd.f32 1e-06, %v99_v59  ;;  %v123_v63 = vsel %vm121_vm4, %v122_v57, %v120_v60  ;;  %v128_v0 = vsub.f32 1.5, %v127_v58 }
 0x113   :  { %v138_v1 = vadd.f32 1e-06, %v123_v63  ;;  %v104_v2 = vsub.f32 1.5, %v103_v61 }
 0x114   :  { %262 = vrcp.f32 %v136_v62  ;;  %v129_v3 = vmul.f32 %v259_v44, %v128_v0  ;;  %v151_v22 = vand.u32 2147483648, %v136_v62  ;;  %v149_v27 = vand.u32 2147483647, %v136_v62 }
 0x115   :  { %264 = vrcp.f32 %v138_v1  ;;  %v105_v4 = vmul.f32 %v261_v46, %v104_v2  ;;  %v181_v28 = vand.u32 2147483648, %v138_v1  ;;  %v179_v30 = vand.u32 2147483647, %v138_v1  ;;  %v251_v46 = vld [vmem:[%s428_s2] ss:$0 sm:$0xff]  ;;  %s353_s2 = smov [#allocation7]  }
 0x116   :  { %v130_v5 = vmul.f32 %v129_v3, %v87_v34  ;;  %vm145_vm11 = vweird.f32 %v136_v62  ;;  %v152_v33 = vor.u32 1.1754944e-38, %v151_v22  ;;  %vm175_vm13 = vweird.f32 %v138_v1  ;;  %s228_s24 = sshll.u32 %s353_s2, 4  ;;  %s229_s24 = int_to_ptr.vmem [resolvable:$true] %s228_s24 }
 0x117   :  { %v106_v7 = vmul.f32 %v105_v4, %v85_v35  ;;  %vm150_vm14 = vcmp.eq.f32.partialorder %v149_v27, 8.507059e+37  ;;  %v182_v37 = vor.u32 1.1754944e-38, %v181_v28  ;;  %vm180_vm0 = vcmp.eq.f32.partialorder %v179_v30, 8.507059e+37 }
 0x118   :  { %v132_v8 = vsel %vm131_vm5, %v87_v34, %v130_v5 }
 0x119   :  { %v135_v10 = vsel %vm133_vm6, %v134_v6, %v132_v8  ;;  %v108_v11 = vsel %vm107_vm7, %v85_v35, %v106_v7 }
 0x11a   :  { %v263_v12 = vpop.eup %262  ;;  %v399_v13 = vadd.f32 1e-06, %v135_v10  ;;  %v111_v14 = vsel %vm109_vm8, %v110_v9, %v108_v11 }
 0x11b   :  { %v265_v17 = vpop.eup %264  ;;  %v401_v18 = vadd.f32 1e-06, %v111_v14  ;;  %v141_v19 = vmul.f32 %v263_v12, %v136_v62  ;;  %vm146_vm9 = vweird.f32 %v263_v12 }
 0x11c   :  { %266 = vrcp.f32 %v399_v13  ;;  %v171_v20 = vmul.f32 %v265_v17, %v138_v1  ;;  %vm176_vm10 = vweird.f32 %v265_v17  ;;  %vm147_vm12 = vmor %vm145_vm11, %vm146_vm9  ;;  %v196_v49 = vand.u32 2147483648, %v399_v13 }
 0x11d   :  { %268 = vrcp.f32 %v401_v18  ;;  %v142_v21 = vsub.f32 1.0, %v141_v19  ;;  %vm177_vm15 = vmor %vm175_vm13, %vm176_vm10  ;;  %v166_v48 = vand.u32 2147483648, %v401_v18  ;;  %v194_v52 = vand.u32 2147483647, %v399_v13 }
 0x11e   :  { %v172_v25 = vsub.f32 1.0, %v171_v20  ;;  %vm190_vm3 = vweird.f32 %v399_v13  ;;  %vm160_vm4 = vweird.f32 %v401_v18  ;;  %v197_v59 = vor.u32 1.1754944e-38, %v196_v49 }
 0x11f   :  { %v143_v26 = vmul.f32 %v263_v12, %v142_v21  ;;  %v167_v60 = vor.u32 1.1754944e-38, %v166_v48  ;;  %vm195_vm7 = vcmp.eq.f32.partialorder %v194_v52, 8.507059e+37 }
 0x120   :  { %v173_v29 = vmul.f32 %v265_v17, %v172_v25 }
 0x121   :  { %v144_v31 = vadd.f32 %v263_v12, %v143_v26 }
 0x122   :  { %v267_v32 = vpop.eup %266  ;;  %v174_v34 = vadd.f32 %v265_v17, %v173_v29 }
 0x123   :  { %v269_v35 = vpop.eup %268  ;;  %v148_v36 = vsel %vm147_vm12, %v263_v12, %v144_v31  ;;  %v186_v38 = vmul.f32 %v267_v32, %v399_v13  ;;  %vm191_vm1 = vweird.f32 %v267_v32 }
 0x124   :  { %v153_v40 = vsel %vm150_vm14, %v152_v33, %v148_v36  ;;  %v156_v41 = vmul.f32 %v269_v35, %v401_v18  ;;  %v178_v42 = vsel %vm177_vm15, %v265_v17, %v174_v34  ;;  %vm161_vm2 = vweird.f32 %v269_v35  ;;  %vm192_vm5 = vmor %vm190_vm3, %vm191_vm1 }
 0x125   :  { %v183_v43 = vsel %vm180_vm0, %v182_v37, %v178_v42  ;;  %v187_v44 = vsub.f32 1.0, %v186_v38  ;;  %v200_v45 = vmul.f32 %v153_v40, %v385_v16  ;;  %v164_v16 = vand.u32 2147483647, %v401_v18  ;;  %vm162_vm6 = vmor %vm160_vm4, %vm161_vm2 }
 0x126   :  { %v157_v47 = vsub.f32 1.0, %v156_v41  ;;  %v202_v50 = vmul.f32 %v183_v43, %v383_v15 }
 0x127   :  { %v188_v51 = vmul.f32 %v267_v32, %v187_v44  ;;  %v208_v53 = vmul.f32 %v250_v39, %v200_v45  ;;  %vm165_vm8 = vcmp.eq.f32.partialorder %v164_v16, 8.507059e+37 }
 0x128   :  { %v158_v54 = vmul.f32 %v269_v35, %v157_v47  ;;  %v210_v55 = vmul.f32 %v250_v39, %v202_v50 }
 0x129   :  { %v189_v56 = vadd.f32 %v267_v32, %v188_v51  ;;  %v216_v57 = vadd.f32 %v251_v46, %v208_v53 }
 0x12a   :  { %v159_v58 = vadd.f32 %v269_v35, %v158_v54  ;;  %v218_v15 = vadd.f32 %v251_v46, %v210_v55 }
 0x12b   :  { %v193_v61 = vsel %vm192_vm5, %v267_v32, %v189_v56  ;;  %220 = vst [vmem:[#allocation7] sm:$0xff] %v216_v57 }
 0x12c   :  { %v163_v62 = vsel %vm162_vm6, %v269_v35, %v159_v58  ;;  %v198_v63 = vsel %vm195_vm7, %v197_v59, %v193_v61  ;;  %222 = vst [vmem:[#allocation7 + $0x10] sm:$0xff] %v218_v15 }
 0x12d   :  { %v168_v0 = vsel %vm165_vm8, %v167_v60, %v163_v62  ;;  %v203_v1 = vmul.f32 %v198_v63, %v391_v23 }
 0x12e   :  { %v201_v2 = vmul.f32 %v168_v0, %v393_v24 }
 0x12f   :  { %v211_v3 = vmul.f32 %v250_v39, %v203_v1 }
 0x130   :  { %v209_v4 = vmul.f32 %v250_v39, %v201_v2 }
 0x131   :  { %v219_v5 = vadd.f32 %v251_v46, %v211_v3 }
 0x132   :  { %v217_v6 = vadd.f32 %v251_v46, %v209_v4 }
 0x133   :  { %223 = vst [vmem:[#allocation7 + $0x18] sm:$0xff] %v219_v5 }
 0x134   :  { %221 = vst [vmem:[#allocation7 + $0x8] sm:$0xff] %v217_v6 }
 0x135   :  { %236 = dma.vmem_to_hbm [thread:$0]  %s229_s24, 512, %s231_s27, [#allocation4], %s349_s20, %s349_s20, %s350_s21  }
 0x136   :  { %346 = dma.done.wait [#allocation4], 512  }
 0x137   :  { %347 = vsyncadd [#allocation4], 4294966784 }
 0x138   :  { %241 = vsyncpa [#allocation3], 1 }
 0x139   :  { %242 = vsyncpa [#allocation6], 1 }
 0x13a   :  { %243 = vsyncpa [#allocation4], 1 }

</bundles_post_ra>
